<compile_context>
chip_gen: v6e
topology: v6e:2x2x1
jax: 0.10.0
libtpu: 0.0.40
codegen_flags: <defaults>
</compile_context>

<pallas_src>
import functools

import jax
import jax.numpy as jnp
from jax.experimental import pallas as pl
from jax.experimental.pallas import tpu as pltpu


def _leaky_relu(x):
    return jnp.maximum(x, 0.01 * x)  # PyTorch default negative_slope=0.01


_ACTS = {
    "leaky_relu": _leaky_relu,
    "tanh": jnp.tanh,
    "none": lambda x: x,
    None: lambda x: x,
}


# ---------------------------------------------------------------------------
# pltpu.roll direction probe (cached).  The fused kernel relies on lane
# rotations for the circular shifts; probing once at runtime makes the kernel
# independent of the rotate sign convention of the installed jax/Mosaic.
# ---------------------------------------------------------------------------
_ROLL_SIGN = None


def _get_roll_sign():
    global _ROLL_SIGN
    if _ROLL_SIGN is None:
        def probe_kernel(x_ref, o_ref):
            o_ref[...] = pltpu.roll(x_ref[...], 1, axis=1)

        x = jnp.arange(8 * 128, dtype=jnp.float32).reshape(8, 128)
        y = pl.pallas_call(
            probe_kernel,
            out_shape=jax.ShapeDtypeStruct((8, 128), jnp.float32),
        )(x)
        if bool(jnp.all(y == jnp.roll(x, 1, axis=1))):
            _ROLL_SIGN = 1
        elif bool(jnp.all(y == jnp.roll(x, -1, axis=1))):
            _ROLL_SIGN = -1
        else:
            raise RuntimeError("unexpected pltpu.roll semantics")
    return _ROLL_SIGN


# ---------------------------------------------------------------------------
# Fused kernel: all conv layers for B batch elements, activations resident in
# VMEM, circular neighbourhoods via exact per-image lane rolls, per-tap MXU
# accumulation (no materialized im2col patch).
# ---------------------------------------------------------------------------
def _make_fused_kernel(acts, kernel_size, wp, hwp, batch_block, c_pad,
                       c_out_pad, compute_dtype, roll_sign):
    p = kernel_size // 2
    n_layers = len(acts)
    taps = [(dy, dx) for dy in range(-p, p + 1) for dx in range(-p, p + 1)]
    bhw = batch_block * hwp
    f32 = jnp.float32

    def shift_of(dy, dx):
        # roll by -(dy*wp + dx) (jnp convention), sign-adjusted for pltpu.roll.
        return (roll_sign * (-(dy * wp + dx))) % hwp

    def roll_images(arr, shift):
        # Roll each image's hwp-wide lane slice independently: the modular
        # rotate inside one image handles the circular y-wrap exactly, the
        # host-side width halo handles x.  hwp is a multiple of 128 when the
        # pad search succeeded, so slices & concat are lane aligned.
        if shift == 0:
            return arr
        if batch_block == 1:
            return pltpu.roll(arr, shift, axis=1)
        parts = [pltpu.roll(arr[:, b * hwp:(b + 1) * hwp], shift, axis=1)
                 for b in range(batch_block)]
        return jnp.concatenate(parts, axis=1)

    def kernel(x_ref, w_ref, b_ref, o_ref, act_ref):
        # ---- layer 0: single input channel -> per-tap outer-product FMA ----
        rows0 = c_out_pad if n_layers == 1 else c_pad
        w0 = w_ref[0]                                     # (c_pad, K*K*c_pad)
        # Splat the input row to 8 sublanes so the rolls use the native
        # (8, 128)-tiled shape; only row 0 is consumed.
        x8 = jnp.broadcast_to(x_ref[...], (8, bhw))
        acc = None
        for s, (dy, dx) in enumerate(taps):
            xr = roll_images(x8, shift_of(dy, dx))[0:1, :].astype(f32)
            wcol = w0[:rows0, s * c_pad:s * c_pad + 1].astype(f32)
            term = wcol * xr                              # (rows0, bhw)
            acc = term if acc is None else acc + term
        z = _ACTS[acts[0]](acc + b_ref[0][:rows0, :])
        if n_layers == 1:
            o_ref[...] = z.astype(o_ref.dtype)
            return
        act_ref[...] = z.astype(act_ref.dtype)

        # ---- layers 1..L-1: per-tap (c, c) @ (c, B*hwp) MXU accumulation ----
        for layer in range(1, n_layers):
            rows = c_out_pad if layer == n_layers - 1 else c_pad
            wl = w_ref[layer]                             # (c_pad, K*K*c_pad)
            a = act_ref[...]                              # (c_pad, bhw)
            acc = None
            for s, (dy, dx) in enumerate(taps):
                ar = roll_images(a, shift_of(dy, dx))
                part = jnp.dot(wl[:rows, s * c_pad:(s + 1) * c_pad], ar,
                               preferred_element_type=jnp.float32)
                acc = part if acc is None else acc + part
            z = _ACTS[acts[layer]](acc + b_ref[layer][:rows, :])
            if layer == n_layers - 1:
                o_ref[...] = z.astype(o_ref.dtype)
            else:
                act_ref[...] = z.astype(act_ref.dtype)

    return kernel


@functools.partial(
    jax.jit,
    static_argnames=("acts", "kernel_size", "pad", "c_pad", "c_out_pad",
                     "out_channels", "batch_block", "roll_sign",
                     "compute_dtype"),
)
def _cnn_forward(v_in, w_stack, b_stack, *, acts, kernel_size, pad, c_pad,
                 c_out_pad, out_channels, batch_block, roll_sign,
                 compute_dtype):
    n, h, w = v_in.shape
    wp = w + 2 * pad
    hwp = h * wp
    bb = batch_block
    g = -(-n // bb)                           # number of grid steps
    n_layers, _, ckk = w_stack.shape
    bhw = bb * hwp

    x = v_in.astype(compute_dtype)
    if g * bb != n:                           # pad batch to a multiple of B
        x = jnp.concatenate(
            [x, jnp.zeros((g * bb - n, h, w), compute_dtype)], axis=0)
    # One cheap circular width-halo pad on the host; the y direction is
    # handled exactly by the in-kernel per-image lane rolls.
    xp = jnp.pad(x, ((0, 0), (0, 0), (pad, pad)), mode="wrap")
    xg = xp.reshape(g, 1, bhw)                # B images concatenated on lanes

    kernel = _make_fused_kernel(acts, kernel_size, wp, hwp, bb, c_pad,
                                c_out_pad, compute_dtype, roll_sign)
    n_tanh = sum(1 for a in acts if a == "tanh")
    cost = pl.CostEstimate(
        flops=int(2 * g * bb * n_layers * c_pad * ckk * hwp),
        transcendentals=int(g * bb * n_tanh * c_pad * hwp),
        bytes_accessed=int(xg.size * xg.dtype.itemsize
                           + w_stack.size * w_stack.dtype.itemsize
                           + 4 * b_stack.size + 4 * g * c_out_pad * bhw),
    )

    out = pl.pallas_call(
        kernel,
        out_shape=jax.ShapeDtypeStruct((g, c_out_pad, bhw), jnp.float32),
        grid_spec=pltpu.PrefetchScalarGridSpec(
            num_scalar_prefetch=0,
            grid=(g,),
            in_specs=[
                pl.BlockSpec((pl.Squeezed(), 1, bhw), lambda i: (i, 0, 0)),
                pl.BlockSpec((n_layers, c_pad, ckk), lambda i: (0, 0, 0)),
                pl.BlockSpec((n_layers, c_pad, 1), lambda i: (0, 0, 0)),
            ],
            out_specs=pl.BlockSpec((pl.Squeezed(), c_out_pad, bhw),
                                   lambda i: (i, 0, 0)),
            scratch_shapes=[
                pltpu.VMEM((c_pad, bhw), compute_dtype),  # resident activations
            ],
        ),
        compiler_params=pltpu.CompilerParams(
            dimension_semantics=("parallel",),
            # > v5e's 16 MiB default scoped limit, <= v7x's 64 MiB per-TC
            # physical budget; explicit buffers are sized to <= ~12 MiB by
            # _select_batch_block below.
            vmem_limit_bytes=32 * 1024 * 1024),
        cost_estimate=cost,
    )(xg, w_stack, b_stack)

    # (g, c_out_pad, B*hwp) -> (N, out_channels, h, w)
    out = out.reshape(g, c_out_pad, bb, h, wp)
    out = out.transpose(0, 2, 1, 3, 4).reshape(g * bb, c_out_pad, h, wp)
    # TODO(synk): downstream consumers could take the padded (c_out_pad, wp)
    # layout directly and skip this extra HBM copy.
    return out[:n, :out_channels, :, pad:pad + w]


# ---------------------------------------------------------------------------
# Module equivalent
# ---------------------------------------------------------------------------
class ConvolutionalNeuralNetworkPallas:
    """Mirror of the PyTorch module: circular Conv2d + activation stack,
    executed as one fused, batch-blocked Pallas TPU kernel."""

    def __init__(self, out_channels, hidden_shape, activation,
                 final_activation="none", use_bias=True, kernel_size=3,
                 key=None, matmul_dtype=jnp.float32):
        assert kernel_size % 2 == 1, "kernel size must be odd"
        network_shape = [1, *hidden_shape, out_channels]
        self.kernel_size = kernel_size
        self.out_channels = out_channels
        self.acts = [activation for _ in hidden_shape] + [final_activation]
        # matmul_dtype=jnp.bfloat16 halves VMEM/DMA and hits the bf16-native
        # MXU on v6e/v7x; default f32 to stay within tight tolerances.
        self._compute_dtype = jnp.dtype(matmul_dtype)

        self.params = []
        key = jax.random.PRNGKey(0) if key is None else key
        for f_in, f_out in zip(network_shape[:-1], network_shape[1:]):
            key, wk, bk = jax.random.split(key, 3)
            fan_in = f_in * kernel_size * kernel_size
            bound = 1.0 / (fan_in ** 0.5)          # PyTorch-style uniform init
            w = jax.random.uniform(wk, (f_out, f_in, kernel_size, kernel_size),
                                   jnp.float32, -bound, bound)
            if use_bias:
                b = jax.random.uniform(bk, (f_out,), jnp.float32, -bound, bound)
            else:
                b = jnp.zeros((f_out,), jnp.float32)
            self.params.append((w, b))

        # Pack weights once: pad channel dims to a multiple of 8 and order the
        # columns (ky, kx, c_in) so columns s*c_pad:(s+1)*c_pad are tap s's
        # (c_out, c_in) matrix, matching the per-tap accumulation in-kernel.
        c_pad = max(8, ((max(network_shape) + 7) // 8) * 8)
        c_out_pad = ((out_channels + 7) // 8) * 8
        self._c_pad = c_pad
        self._c_out_pad = c_out_pad
        k = kernel_size
        w_mats, b_cols = [], []
        for w, b in self.params:
            f_out, f_in = w.shape[0], w.shape[1]
            w_pad = jnp.zeros((c_pad, c_pad, k, k),
                              jnp.float32).at[:f_out, :f_in].set(w)
            w_mats.append(w_pad.transpose(0, 2, 3, 1).reshape(c_pad,
                                                              k * k * c_pad))
            b_pad = jnp.zeros((c_pad,), jnp.float32).at[:f_out].set(b)
            b_cols.append(b_pad.reshape(c_pad, 1))
        self._w_stack = jnp.stack(w_mats).astype(self._compute_dtype)
        self._b_stack = jnp.stack(b_cols)                 # bias stays f32

    # -- tiling heuristics ---------------------------------------------------
    def _select_pad(self, h, w):
        p = self.kernel_size // 2
        halo = len(self.acts) * p            # shrinking-halo columns per side
        wp_min = w + 2 * halo
        # Keep the per-image lane extent a multiple of 128 (lane-dense stores,
        # aligned per-image slices) only if it costs <= ~12.5% extra columns;
        # otherwise keep the minimal halo — masked stores are cheaper than
        # 2-4x extra columns for awkward lattice sizes.
        max_extra_cols = max(2, wp_min // 8)
        pad = halo
        for cand in range(halo, halo + max_extra_cols // 2 + 1):
            if (h * (w + 2 * cand)) % 128 == 0:
                pad = cand
                break
        return pad

    def _select_batch_block(self, n, hwp):
        itemsize = int(jnp.dtype(self._compute_dtype).itemsize)
        c_pad, c_out_pad = self._c_pad, self._c_out_pad
        # Rough per-image VMEM bytes per grid step: double-buffered input block
        # (1 row padded to 8 sublanes), double-buffered f32 output block, the
        # resident activation slab, and ~2 slabs of roll/accumulator temps.
        per_img = hwp * (2 * 8 * itemsize + 2 * c_out_pad * 4
                         + 3 * c_pad * itemsize + 2 * c_pad * 4)
        budget = 12 * 1024 * 1024
        b = max(1, min(budget // per_img, 32))  # cap: in-kernel roll count ~ B
        if n >= 2:
            b = min(b, (n + 1) // 2)            # keep grid >= 2 (2 TCs on v7x)
        return int(min(b, n))

    def __call__(self, v_in):
        # v_in: (N, L_x, L_y) -> (N, out_channels, L_x, L_y)
        n, h, w = v_in.shape
        pad = self._select_pad(h, w)
        hwp = h * (w + 2 * pad)
        bb = self._select_batch_block(n, hwp)
        return _cnn_forward(
            v_in, self._w_stack, self._b_stack,
            acts=tuple(self.acts), kernel_size=self.kernel_size, pad=pad,
            c_pad=self._c_pad, c_out_pad=self._c_out_pad,
            out_channels=self.out_channels, batch_block=bb,
            roll_sign=_get_roll_sign(), compute_dtype=self._compute_dtype)


# ---------------------------------------------------------------------------
# Pure-JAX reference (for correctness check)
# ---------------------------------------------------------------------------
def ref_forward(v_in, params, acts, K):
    x = v_in[:, None, :, :]
    p = K // 2
    for (w, b), act in zip(params, acts):
        xp = jnp.pad(x, ((0, 0), (0, 0), (p, p), (p, p)), mode="wrap")
        y = jax.lax.conv_general_dilated(
            xp, w, window_strides=(1, 1), padding="VALID",
            dimension_numbers=("NCHW", "OIHW", "NCHW"))
        x = _ACTS[act](y + b[None, :, None, None])
    return x


if __name__ == "__main__":
    key = jax.random.PRNGKey(0)
    key, xkey, pkey = jax.random.split(key, 3)

    N, L = 2, 16
    v_in = jax.random.normal(xkey, (N, L, L), dtype=jnp.float32)

    model = ConvolutionalNeuralNetworkPallas(
        out_channels=2,
        hidden_shape=(8, 8),
        activation="leaky_relu",
        final_activation="none",
        use_bias=True,
        kernel_size=3,
        key=pkey,
    )

    out = model(v_in)
    out = jax.block_until_ready(out)

    expected = ref_forward(v_in, model.params, model.acts, model.kernel_size)
    assert out.shape == (N, 2, L, L), out.shape
    max_err = float(jnp.max(jnp.abs(out - expected)))
    assert jnp.allclose(out, expected, atol=2e-4, rtol=2e-4), max_err

    print("KERNEL_OK")
</pallas_src>

<mosaic_0001>
module attributes {stable_mosaic.version = 11 : i64} {
  func.func @probe_kernel(%arg0: memref<8x128xf32, #tpu.memory_space<vmem>>, %arg1: memref<8x128xf32, #tpu.memory_space<vmem>>) attributes {dimension_semantics = [], scalar_prefetch = 0 : i64, scratch_operands = 0 : i64, tpu.core_type = #tpu.core_type<tc>} {
    %c0 = arith.constant 0 : index
    %c0_0 = arith.constant 0 : index
    %0 = vector.load %arg0[%c0, %c0_0] : memref<8x128xf32, #tpu.memory_space<vmem>>, vector<8x128xf32>
    %c1_i32 = arith.constant 1 : i32
    %1 = tpu.dynamic_rotate %0 by %c1_i32 dim 1 : vector<8x128xf32>, i32 -> vector<8x128xf32>
    %c0_1 = arith.constant 0 : index
    %c0_2 = arith.constant 0 : index
    %2 = vector.load %arg1[%c0_1, %c0_2] : memref<8x128xf32, #tpu.memory_space<vmem>>, vector<8x128xf32>
    tpu.vector_store %arg1[%c0_1, %c0_2], %1 {strides = array<i32>} : memref<8x128xf32, #tpu.memory_space<vmem>>, vector<8x128xf32>,
    return
  }
}

</mosaic_0001>

<bundles_post_ra>
// kernel: tpu_custom_call.1
= control target key start
LH: loop header
LB: loop body
LE: loop exit
PB: predicated region body
PF: predicated region fallthrough
CT: control target
= control target key end

     0   :  { %6 = vsyncpa [#allocation3], 0  ;;  %s106_s0 = inlined_call_operand.hbm [shape: f32[8,128], index: 0, kind: input, shape index: {}]   ;;  %s107_s1 = inlined_call_operand.hbm [shape: f32[8,128], index: 1, kind: output, shape index: {}]  }
   0x1   :  { %7 = vsyncpa [#allocation4], 0  ;;  %s87_s6 = smov [#allocation2]  }
   0x2   :  { %s14_s7 = sshll.u32 %s87_s6, 4  ;;  %s15_s7 = int_to_ptr.vmem [resolvable:$true] %s14_s7 }
   0x3   :  { %s51_s8 = scalar_lea.vmem %s15_s7, 128  ;;  %p56_p1 = scmp.lt.s32.totalorder %s15_s7, %s15_s7 }
   0x4   :  { %p52_p0 = scmp.ne.s32.totalorder %s15_s7, %s51_s8  ;;  %p57_p2 = scmp.lt.s32.totalorder %s51_s8, %s51_s8 }
   0x6   :  { %p58_p3 = por %p57_p2, %p56_p1 }
   0x8   :  { %p59_p4 = pnand %p58_p3, %p52_p0 }
   0xa   :  { %62 = shalt.err (!%p59_p4)
}
   0xb   :  { %17 = dma.hbm_to_vmem [thread:$0]  %s106_s0, 128, %s15_s7, [#allocation3]  }
   0xc   :  { %83 = dma.done.wait [#allocation3], 128  }
   0xd   :  { %84 = vsyncadd [#allocation3], 4294967168  ;;  %v21_v0 = vld [vmem:[#allocation2] sm:$0xff]  ;;  %s88_s11 = smov 1   ;;  %s89_s12 = smov [#allocation5]  }
   0xe   :  { %22 = vrot.lane.b32.xlu0 %v21_v0, %s88_s11  ;;  %s31_s13 = sshll.u32 %s89_s12, 4  ;;  %s32_s13 = int_to_ptr.vmem [resolvable:$true] %s31_s13 }
   0xf   :  { %s63_s14 = scalar_lea.vmem %s32_s13, 128  ;;  %p68_p6 = scmp.lt.s32.totalorder %s32_s13, %s32_s13 }
  0x10   :  { %p64_p5 = scmp.ne.s32.totalorder %s32_s13, %s63_s14  ;;  %p69_p7 = scmp.lt.s32.totalorder %s63_s14, %s63_s14 }
  0x12   :  { %p70_p8 = por %p69_p7, %p68_p6 }
  0x14   :  { %p71_p9 = pnand %p70_p8, %p64_p5 }
  0x80   :  { %v23_v1 = vpop.permute.xlu0 %22 }
  0x81   :  { %24 = vst [vmem:[#allocation5] sm:$0xff] %v23_v1 }
  0x82   :  { %74 = shalt.err (!%p71_p9)
}
  0x83   :  { %34 = dma.vmem_to_hbm [thread:$0]  %s32_s13, 128, %s107_s1, [#allocation4]  }
  0x84   :  { %85 = dma.done.wait [#allocation4], 128  }
  0x85   :  { %86 = vsyncadd [#allocation4], 4294967168 }
  0x86   :  { %38 = vsyncpa [#allocation3], 1 }
  0x87   :  { %39 = vsyncpa [#allocation4], 1 }

</bundles_post_ra>
